<compile_context>
chip_gen: v7x
topology: tpu7x:2x2x1
jax: 0.10.0
libtpu: 0.0.40
codegen_flags: <defaults>
</compile_context>

<pallas_src>
import functools

import jax
import jax.numpy as jnp
from jax.experimental import pallas as pl
from jax.experimental.pallas import tpu as pltpu


def _round_up(x, m):
    return ((x + m - 1) // m) * m


def _cdiv(a, b):
    return -(-a // b)


_ALIGN = 16  # bf16 sublane packing for intermediates / output tiles


def dqn_kernel(x_ref,
               w1_ref, b1_ref,
               w2_ref, b2_ref,
               w3_ref, b3_ref,
               w4_ref, b4_ref,
               w5_ref, b5_ref,
               o_ref):
    """Fused forward pass for one batch tile: relu(fc1..fc4) -> fc5.

    x_ref:  [TILE_B, n_obs]   f32 (unpadded feature dim; cast to bf16 here)
    w*_ref: [in, out]         bf16 (pre-transposed, VMEM-resident)
    b*_ref: [1, out]          f32
    o_ref:  [TILE_B, OUT_PAD] bf16 (lane-dense, padded output)
    """
    h = x_ref[...].astype(jnp.bfloat16)

    h = jnp.dot(h, w1_ref[...], preferred_element_type=jnp.float32) + b1_ref[...]
    h = jnp.maximum(h, 0.0).astype(jnp.bfloat16)

    h = jnp.dot(h, w2_ref[...], preferred_element_type=jnp.float32) + b2_ref[...]
    h = jnp.maximum(h, 0.0).astype(jnp.bfloat16)

    h = jnp.dot(h, w3_ref[...], preferred_element_type=jnp.float32) + b3_ref[...]
    h = jnp.maximum(h, 0.0).astype(jnp.bfloat16)

    h = jnp.dot(h, w4_ref[...], preferred_element_type=jnp.float32) + b4_ref[...]
    h = jnp.maximum(h, 0.0).astype(jnp.bfloat16)

    out = jnp.dot(h, w5_ref[...], preferred_element_type=jnp.float32) + b5_ref[...]
    o_ref[...] = out.astype(o_ref.dtype)


def init_dqn_params(key, n_observations, n_actions, dtype=jnp.float32):
    """PyTorch-style init U(-1/sqrt(fan_in), 1/sqrt(fan_in)).

    Returns logical params: list of (w [in, out] f32, b [out] f32).
    """
    dims = [n_observations, 128, 256, 512, 128, n_actions]
    params = []
    for i in range(5):
        fan_in, fan_out = dims[i], dims[i + 1]
        key, kw, kb = jax.random.split(key, 3)
        bound = 1.0 / (fan_in ** 0.5)
        w = jax.random.uniform(kw, (fan_in, fan_out), dtype=dtype,
                               minval=-bound, maxval=bound)
        b = jax.random.uniform(kb, (fan_out,), dtype=dtype,
                               minval=-bound, maxval=bound)
        params.append((w, b))
    return params


def prepare_params(params, n_actions):
    """One-time offline prep: cast weights to bf16, pad only fc5's output
    columns (and bias) to a lane-dense multiple of 128. The input feature dim
    is NOT padded anymore (Mosaic pads K internally)."""
    out_pad = _round_up(n_actions, 128)
    prepared = []
    n_layers = len(params)
    for i, (w, b) in enumerate(params):
        w = jnp.asarray(w, jnp.float32)
        b = jnp.asarray(b, jnp.float32)
        if i == n_layers - 1 and w.shape[1] != out_pad:
            w = jnp.pad(w, ((0, 0), (0, out_pad - w.shape[1])))
            b = jnp.pad(b, (0, out_pad - b.shape[0]))
        prepared.append((w.astype(jnp.bfloat16), b.reshape(1, -1)))
    return prepared


def _choose_batch_tile(batch, target_tile):
    """Pick (tile_b, padded_batch) balancing: big tiles (amortize per-step
    overhead), MXU-aligned M when cheap, >=2 tiles for v7x megacore when
    batch > 256, and minimal ragged-batch padding waste."""
    b_al = _round_up(max(batch, 1), _ALIGN)
    n_tiles = max(1, _cdiv(b_al, target_tile))
    if b_al > 256:
        n_tiles = max(n_tiles, 2)       # keep both v7x TensorCores busy
    tb = _round_up(_cdiv(b_al, n_tiles), _ALIGN)
    # Prefer MXU-height-aligned tiles (256 on v6e/v7x, 128 on v5e) when the
    # extra batch padding this would introduce stays small.
    for mxu_align in (256, 128):
        tb_a = _round_up(tb, mxu_align)
        waste = _cdiv(b_al, tb_a) * tb_a - batch
        if waste <= max(tb_a // 4, _ALIGN):
            tb = tb_a
            break
    padded_batch = _round_up(b_al, tb)
    return tb, padded_batch


@functools.partial(jax.jit, static_argnums=(2, 3))
def dqn_forward(x, prepared_params, n_actions, target_tile_b=1024):
    """x: [batch, n_observations] f32 -> [batch, n_actions] f32."""
    batch, n_obs = x.shape
    out_pad = prepared_params[-1][0].shape[1]

    tb, padded_batch = _choose_batch_tile(batch, target_tile_b)
    if padded_batch != batch:
        # Minimal row pad only (no feature pad, no dtype round-trip).
        x = jnp.pad(x, ((0, padded_batch - batch), (0, 0)))

    flat_params = []
    for w, b in prepared_params:
        flat_params.extend([w, b])

    def x_map(i):          # batch-tiled input
        return (i, 0)

    def const_map(i):      # weights/biases: same block every iteration
        return (0, 0)      # -> DMA'd once, VMEM-resident across the grid

    # Block last dim == full array dim (n_obs) uses the full-dim exception;
    # Mosaic pads the small contraction dim internally.
    in_specs = [pl.BlockSpec((tb, n_obs), x_map)]
    for w, b in prepared_params:
        in_specs.append(pl.BlockSpec(w.shape, const_map))
        in_specs.append(pl.BlockSpec(b.shape, const_map))

    out = pl.pallas_call(
        dqn_kernel,
        out_shape=jax.ShapeDtypeStruct((padded_batch, out_pad), jnp.bfloat16),
        grid=(padded_batch // tb,),
        in_specs=in_specs,
        out_specs=pl.BlockSpec((tb, out_pad), lambda i: (i, 0)),
        compiler_params=pltpu.CompilerParams(
            dimension_semantics=("parallel",)),
    )(x, *flat_params)

    return out[:batch, :n_actions].astype(jnp.float32)


def dqn_reference(x, params):
    """Plain-JAX reference emulating the kernel's bf16/f32-accumulate math
    (including the bf16 output store)."""
    h = x.astype(jnp.bfloat16)
    n_layers = len(params)
    for i, (w, b) in enumerate(params):
        h = jnp.dot(h, w.astype(jnp.bfloat16),
                    preferred_element_type=jnp.float32) + b
        if i < n_layers - 1:
            h = jnp.maximum(h, 0.0).astype(jnp.bfloat16)
    return h.astype(jnp.bfloat16).astype(jnp.float32)


if __name__ == "__main__":
    key = jax.random.PRNGKey(0)
    k_params, k_x, k_x2 = jax.random.split(key, 3)

    # Shapes consistent with the module: DQN(n_observations=8, n_actions=4)
    n_observations = 8
    n_actions = 4

    params = init_dqn_params(k_params, n_observations, n_actions)
    prepared = prepare_params(params, n_actions)

    # 1) Tiny batch: single tile, exercises the latency path.
    batch = 8
    x = jax.random.normal(k_x, (batch, n_observations), dtype=jnp.float32)
    out = jax.block_until_ready(dqn_forward(x, prepared, n_actions))
    ref = dqn_reference(x, params)
    assert out.shape == (batch, n_actions), out.shape
    assert jnp.allclose(out, ref, atol=1e-2, rtol=1e-2), "mismatch (batch=8)"

    # 2) Ragged batch: exercises multi-tile grid (2 parallel tiles of 144)
    #    with minimal padding (272 -> 288 rows). Still tiny in absolute size.
    batch2 = 272
    x2 = jax.random.normal(k_x2, (batch2, n_observations), dtype=jnp.float32)
    out2 = jax.block_until_ready(dqn_forward(x2, prepared, n_actions))
    ref2 = dqn_reference(x2, params)
    assert out2.shape == (batch2, n_actions), out2.shape
    assert jnp.allclose(out2, ref2, atol=1e-2, rtol=1e-2), "mismatch (batch=272)"

    print("KERNEL_OK")
</pallas_src>

<mosaic_0001>
module attributes {stable_mosaic.version = 11 : i64} {
  func.func @dqn_kernel(%arg0: i32, %arg1: memref<16x8xf32, #tpu.memory_space<vmem>>, %arg2: memref<8x128xbf16, #tpu.memory_space<vmem>>, %arg3: memref<1x128xf32, #tpu.memory_space<vmem>>, %arg4: memref<128x256xbf16, #tpu.memory_space<vmem>>, %arg5: memref<1x256xf32, #tpu.memory_space<vmem>>, %arg6: memref<256x512xbf16, #tpu.memory_space<vmem>>, %arg7: memref<1x512xf32, #tpu.memory_space<vmem>>, %arg8: memref<512x128xbf16, #tpu.memory_space<vmem>>, %arg9: memref<1x128xf32, #tpu.memory_space<vmem>>, %arg10: memref<128x128xbf16, #tpu.memory_space<vmem>>, %arg11: memref<1x128xf32, #tpu.memory_space<vmem>>, %arg12: memref<16x128xbf16, #tpu.memory_space<vmem>>) attributes {dimension_semantics = [#tpu.dimension_semantics<parallel>], iteration_bounds = array<i64: 1>, scalar_prefetch = 0 : i64, scratch_operands = 0 : i64, tpu.core_type = #tpu.core_type<tc>, window_params = [{transform_indices = @transform_0, window_bounds = array<i64: 16, 8>}, {pipeline_mode = #tpu.pipeline_mode<synchronous>, transform_indices = @transform_1, window_bounds = array<i64: 8, 128>}, {pipeline_mode = #tpu.pipeline_mode<synchronous>, transform_indices = @transform_2, window_bounds = array<i64: 1, 128>}, {pipeline_mode = #tpu.pipeline_mode<synchronous>, transform_indices = @transform_3, window_bounds = array<i64: 128, 256>}, {pipeline_mode = #tpu.pipeline_mode<synchronous>, transform_indices = @transform_4, window_bounds = array<i64: 1, 256>}, {pipeline_mode = #tpu.pipeline_mode<synchronous>, transform_indices = @transform_5, window_bounds = array<i64: 256, 512>}, {pipeline_mode = #tpu.pipeline_mode<synchronous>, transform_indices = @transform_6, window_bounds = array<i64: 1, 512>}, {pipeline_mode = #tpu.pipeline_mode<synchronous>, transform_indices = @transform_7, window_bounds = array<i64: 512, 128>}, {pipeline_mode = #tpu.pipeline_mode<synchronous>, transform_indices = @transform_8, window_bounds = array<i64: 1, 128>}, {pipeline_mode = #tpu.pipeline_mode<synchronous>, transform_indices = @transform_9, window_bounds = array<i64: 128, 128>}, {pipeline_mode = #tpu.pipeline_mode<synchronous>, transform_indices = @transform_10, window_bounds = array<i64: 1, 128>}, {transform_indices = @transform_11, window_bounds = array<i64: 16, 128>}]} {
    %c0 = arith.constant 0 : index
    %c0_0 = arith.constant 0 : index
    %0 = vector.load %arg1[%c0, %c0_0] : memref<16x8xf32, #tpu.memory_space<vmem>>, vector<16x8xf32>
    %1 = arith.truncf %0 : vector<16x8xf32> to vector<16x8xbf16>
    %c0_1 = arith.constant 0 : index
    %c0_2 = arith.constant 0 : index
    %2 = vector.load %arg2[%c0_1, %c0_2] : memref<8x128xbf16, #tpu.memory_space<vmem>>, vector<8x128xbf16>
    %cst = arith.constant dense<0.000000e+00> : vector<16x128xf32>
    %3 = tpu.matmul %1, %2, %cst {dimension_numbers = #tpu.dot_dimension_numbers<[1], [0], [0], [1], [0, 0, 1, 1], [], []>} : vector<16x8xbf16>, vector<8x128xbf16>, vector<16x128xf32> -> vector<16x128xf32>
    %c0_3 = arith.constant 0 : index
    %c0_4 = arith.constant 0 : index
    %4 = vector.load %arg3[%c0_3, %c0_4] : memref<1x128xf32, #tpu.memory_space<vmem>>, vector<1x128xf32>
    %5 = vector.broadcast %4 : vector<1x128xf32> to vector<16x128xf32>
    %6 = arith.addf %3, %5 : vector<16x128xf32>
    %cst_5 = arith.constant 0.000000e+00 : f32
    %7 = vector.broadcast %cst_5 : f32 to vector<16x128xf32>
    %8 = arith.maximumf %6, %7 : vector<16x128xf32>
    %9 = arith.truncf %8 : vector<16x128xf32> to vector<16x128xbf16>
    %c0_6 = arith.constant 0 : index
    %c0_7 = arith.constant 0 : index
    %10 = vector.load %arg4[%c0_6, %c0_7] : memref<128x256xbf16, #tpu.memory_space<vmem>>, vector<128x256xbf16>
    %cst_8 = arith.constant dense<0.000000e+00> : vector<16x256xf32>
    %11 = tpu.matmul %9, %10, %cst_8 {dimension_numbers = #tpu.dot_dimension_numbers<[1], [0], [0], [1], [0, 0, 1, 1], [], []>} : vector<16x128xbf16>, vector<128x256xbf16>, vector<16x256xf32> -> vector<16x256xf32>
    %c0_9 = arith.constant 0 : index
    %c0_10 = arith.constant 0 : index
    %12 = vector.load %arg5[%c0_9, %c0_10] : memref<1x256xf32, #tpu.memory_space<vmem>>, vector<1x256xf32>
    %13 = vector.broadcast %12 : vector<1x256xf32> to vector<16x256xf32>
    %14 = arith.addf %11, %13 : vector<16x256xf32>
    %cst_11 = arith.constant 0.000000e+00 : f32
    %15 = vector.broadcast %cst_11 : f32 to vector<16x256xf32>
    %16 = arith.maximumf %14, %15 : vector<16x256xf32>
    %17 = arith.truncf %16 : vector<16x256xf32> to vector<16x256xbf16>
    %c0_12 = arith.constant 0 : index
    %c0_13 = arith.constant 0 : index
    %18 = vector.load %arg6[%c0_12, %c0_13] : memref<256x512xbf16, #tpu.memory_space<vmem>>, vector<256x512xbf16>
    %cst_14 = arith.constant dense<0.000000e+00> : vector<16x512xf32>
    %19 = tpu.matmul %17, %18, %cst_14 {dimension_numbers = #tpu.dot_dimension_numbers<[1], [0], [0], [1], [0, 0, 1, 1], [], []>} : vector<16x256xbf16>, vector<256x512xbf16>, vector<16x512xf32> -> vector<16x512xf32>
    %c0_15 = arith.constant 0 : index
    %c0_16 = arith.constant 0 : index
    %20 = vector.load %arg7[%c0_15, %c0_16] : memref<1x512xf32, #tpu.memory_space<vmem>>, vector<1x512xf32>
    %21 = vector.broadcast %20 : vector<1x512xf32> to vector<16x512xf32>
    %22 = arith.addf %19, %21 : vector<16x512xf32>
    %cst_17 = arith.constant 0.000000e+00 : f32
    %23 = vector.broadcast %cst_17 : f32 to vector<16x512xf32>
    %24 = arith.maximumf %22, %23 : vector<16x512xf32>
    %25 = arith.truncf %24 : vector<16x512xf32> to vector<16x512xbf16>
    %c0_18 = arith.constant 0 : index
    %c0_19 = arith.constant 0 : index
    %26 = vector.load %arg8[%c0_18, %c0_19] : memref<512x128xbf16, #tpu.memory_space<vmem>>, vector<512x128xbf16>
    %cst_20 = arith.constant dense<0.000000e+00> : vector<16x128xf32>
    %27 = tpu.matmul %25, %26, %cst_20 {dimension_numbers = #tpu.dot_dimension_numbers<[1], [0], [0], [1], [0, 0, 1, 1], [], []>} : vector<16x512xbf16>, vector<512x128xbf16>, vector<16x128xf32> -> vector<16x128xf32>
    %c0_21 = arith.constant 0 : index
    %c0_22 = arith.constant 0 : index
    %28 = vector.load %arg9[%c0_21, %c0_22] : memref<1x128xf32, #tpu.memory_space<vmem>>, vector<1x128xf32>
    %29 = vector.broadcast %28 : vector<1x128xf32> to vector<16x128xf32>
    %30 = arith.addf %27, %29 : vector<16x128xf32>
    %cst_23 = arith.constant 0.000000e+00 : f32
    %31 = vector.broadcast %cst_23 : f32 to vector<16x128xf32>
    %32 = arith.maximumf %30, %31 : vector<16x128xf32>
    %33 = arith.truncf %32 : vector<16x128xf32> to vector<16x128xbf16>
    %c0_24 = arith.constant 0 : index
    %c0_25 = arith.constant 0 : index
    %34 = vector.load %arg10[%c0_24, %c0_25] : memref<128x128xbf16, #tpu.memory_space<vmem>>, vector<128x128xbf16>
    %cst_26 = arith.constant dense<0.000000e+00> : vector<16x128xf32>
    %35 = tpu.matmul %33, %34, %cst_26 {dimension_numbers = #tpu.dot_dimension_numbers<[1], [0], [0], [1], [0, 0, 1, 1], [], []>} : vector<16x128xbf16>, vector<128x128xbf16>, vector<16x128xf32> -> vector<16x128xf32>
    %c0_27 = arith.constant 0 : index
    %c0_28 = arith.constant 0 : index
    %36 = vector.load %arg11[%c0_27, %c0_28] : memref<1x128xf32, #tpu.memory_space<vmem>>, vector<1x128xf32>
    %37 = vector.broadcast %36 : vector<1x128xf32> to vector<16x128xf32>
    %38 = arith.addf %35, %37 : vector<16x128xf32>
    %39 = arith.truncf %38 : vector<16x128xf32> to vector<16x128xbf16>
    %c0_29 = arith.constant 0 : index
    %c0_30 = arith.constant 0 : index
    %40 = vector.load %arg12[%c0_29, %c0_30] : memref<16x128xbf16, #tpu.memory_space<vmem>>, vector<16x128xbf16>
    tpu.vector_store %arg12[%c0_29, %c0_30], %39 {strides = array<i32>} : memref<16x128xbf16, #tpu.memory_space<vmem>>, vector<16x128xbf16>,
    return
  }
  func.func @transform_0(%arg0: i32) -> (i32, i32) {
    %c0_i32 = arith.constant 0 : i32
    %c0_i32_0 = arith.constant 0 : i32
    return %arg0, %c0_i32 : i32, i32
  }
  func.func @transform_1(%arg0: i32) -> (i32, i32) {
    %c0_i32 = arith.constant 0 : i32
    %c0_i32_0 = arith.constant 0 : i32
    %c0_i32_1 = arith.constant 0 : i32
    return %c0_i32, %c0_i32_0 : i32, i32
  }
  func.func @transform_2(%arg0: i32) -> (i32, i32) {
    %c0_i32 = arith.constant 0 : i32
    %c0_i32_0 = arith.constant 0 : i32
    %c0_i32_1 = arith.constant 0 : i32
    return %c0_i32, %c0_i32_0 : i32, i32
  }
  func.func @transform_3(%arg0: i32) -> (i32, i32) {
    %c0_i32 = arith.constant 0 : i32
    %c0_i32_0 = arith.constant 0 : i32
    %c0_i32_1 = arith.constant 0 : i32
    return %c0_i32, %c0_i32_0 : i32, i32
  }
  func.func @transform_4(%arg0: i32) -> (i32, i32) {
    %c0_i32 = arith.constant 0 : i32
    %c0_i32_0 = arith.constant 0 : i32
    %c0_i32_1 = arith.constant 0 : i32
    return %c0_i32, %c0_i32_0 : i32, i32
  }
  func.func @transform_5(%arg0: i32) -> (i32, i32) {
    %c0_i32 = arith.constant 0 : i32
    %c0_i32_0 = arith.constant 0 : i32
    %c0_i32_1 = arith.constant 0 : i32
    return %c0_i32, %c0_i32_0 : i32, i32
  }
  func.func @transform_6(%arg0: i32) -> (i32, i32) {
    %c0_i32 = arith.constant 0 : i32
    %c0_i32_0 = arith.constant 0 : i32
    %c0_i32_1 = arith.constant 0 : i32
    return %c0_i32, %c0_i32_0 : i32, i32
  }
  func.func @transform_7(%arg0: i32) -> (i32, i32) {
    %c0_i32 = arith.constant 0 : i32
    %c0_i32_0 = arith.constant 0 : i32
    %c0_i32_1 = arith.constant 0 : i32
    return %c0_i32, %c0_i32_0 : i32, i32
  }
  func.func @transform_8(%arg0: i32) -> (i32, i32) {
    %c0_i32 = arith.constant 0 : i32
    %c0_i32_0 = arith.constant 0 : i32
    %c0_i32_1 = arith.constant 0 : i32
    return %c0_i32, %c0_i32_0 : i32, i32
  }
  func.func @transform_9(%arg0: i32) -> (i32, i32) {
    %c0_i32 = arith.constant 0 : i32
    %c0_i32_0 = arith.constant 0 : i32
    %c0_i32_1 = arith.constant 0 : i32
    return %c0_i32, %c0_i32_0 : i32, i32
  }
  func.func @transform_10(%arg0: i32) -> (i32, i32) {
    %c0_i32 = arith.constant 0 : i32
    %c0_i32_0 = arith.constant 0 : i32
    %c0_i32_1 = arith.constant 0 : i32
    return %c0_i32, %c0_i32_0 : i32, i32
  }
  func.func @transform_11(%arg0: i32) -> (i32, i32) {
    %c0_i32 = arith.constant 0 : i32
    %c0_i32_0 = arith.constant 0 : i32
    return %arg0, %c0_i32 : i32, i32
  }
}

</mosaic_0001>

<bundles_post_ra>
// kernel: dqn_forward.1
= control target key start
LH: loop header
LB: loop body
LE: loop exit
PB: predicated region body
PF: predicated region fallthrough
CT: control target
= control target key end

     0   :  { %16 = vsyncpa [#allocation3], 0  ;;  %s1951_s0 = inlined_call_operand.vmem [shape: f32[16,8], index: 0, kind: input, shape index: {}]   ;;  %s1952_s1 = inlined_call_operand.vmem [shape: bf16[8,128], index: 1, kind: input, shape index: {}]   ;;  %s1953_s2 = inlined_call_operand.vmem [shape: f32[1,128], index: 2, kind: input, shape index: {}]   ;;  %s1954_s3 = inlined_call_operand.hbm [shape: bf16[128,256], index: 3, kind: input, shape index: {}]   ;;  %s1955_s4 = inlined_call_operand.vmem [shape: f32[1,256], index: 4, kind: input, shape index: {}]   ;;  %s1956_s5 = inlined_call_operand.hbm [shape: bf16[256,512], index: 5, kind: input, shape index: {}]   ;;  %s1957_s6 = inlined_call_operand.vmem [shape: f32[1,512], index: 6, kind: input, shape index: {}]   ;;  %s1958_s7 = inlined_call_operand.hbm [shape: bf16[512,128], index: 7, kind: input, shape index: {}]   ;;  %s1959_s8 = inlined_call_operand.vmem [shape: f32[1,128], index: 8, kind: input, shape index: {}]   ;;  %s1960_s9 = inlined_call_operand.hbm [shape: bf16[128,128], index: 9, kind: input, shape index: {}]   ;;  %s1961_s10 = inlined_call_operand.vmem [shape: f32[1,128], index: 10, kind: input, shape index: {}]   ;;  %s1962_s11 = inlined_call_operand.vmem [shape: bf16[16,128], index: 11, kind: output, shape index: {}]  }
   0x1   :  { %17 = vsyncpa [#allocation5], 0 }
   0x2   :  { %18 = vsyncpa [#allocation8], 0  ;;  %s1776_s17 = smov [#allocation4]   ;;  %s1682_s21 = scalar_lea.hbm %s1956_s5, 8192 }
   0x3   :  { %s44_s18 = sshll.u32 %s1776_s17, 4  ;;  %p1683_p0 = scmp.ne.s32.totalorder %s1956_s5, %s1682_s21  ;;  %s45_s18 = int_to_ptr.vmem [resolvable:$true] %s44_s18 }
   0x4   :  { %p1686_p1 = scmp.lt.u32.totalorder %s1682_s21, %s1956_s5 }
   0x6   :  { %p1688_p2 = pnand %p1686_p1, %p1683_p0 }
   0x8   :  { %1691 = shalt.err (!%p1688_p2)
}
   0x9   :  { %s1692_s26 = scalar_lea.vmem %s45_s18, 8192  ;;  %p1697_p4 = scmp.lt.s32.totalorder %s45_s18, %s45_s18 }
   0xa   :  { %p1693_p3 = scmp.ne.s32.totalorder %s45_s18, %s1692_s26  ;;  %p1698_p5 = scmp.lt.s32.totalorder %s1692_s26, %s1692_s26 }
   0xc   :  { %p1699_p6 = por %p1698_p5, %p1697_p4 }
   0xe   :  { %p1700_p7 = pnand %p1699_p6, %p1693_p3 }
  0x10   :  { %1703 = shalt.err (!%p1700_p7)
}
  0x11   :  { %s1777_s27 = smov 256   ;;  %s1778_s28 = smov 16  }
  0x12   :  { %50 = dma.hbm_to_vmem [thread:$0]  %s1956_s5, 8192, %s45_s18, [#allocation5], %s1777_s27, %s1777_s27, %s1778_s28  }
  0x13   :  { %s1779_s12 = smov [#allocation2]   ;;  %s1704_s16 = scalar_lea.hbm %s1954_s3, 2048 }
  0x14   :  { %s30_s13 = sshll.u32 %s1779_s12, 4  ;;  %p1705_p8 = scmp.ne.s32.totalorder %s1954_s3, %s1704_s16  ;;  %s31_s13 = int_to_ptr.vmem [resolvable:$true] %s30_s13 }
  0x15   :  { %p1708_p9 = scmp.lt.u32.totalorder %s1704_s16, %s1954_s3 }
  0x17   :  { %p1710_p10 = pnand %p1708_p9, %p1705_p8 }
  0x19   :  { %1713 = shalt.err (!%p1710_p10)
}
  0x1a   :  { %s1714_s22 = scalar_lea.vmem %s31_s13, 2048  ;;  %p1719_p12 = scmp.lt.s32.totalorder %s31_s13, %s31_s13 }
  0x1b   :  { %p1715_p11 = scmp.ne.s32.totalorder %s31_s13, %s1714_s22  ;;  %p1720_p13 = scmp.lt.s32.totalorder %s1714_s22, %s1714_s22 }
  0x1d   :  { %p1721_p0 = por %p1720_p13, %p1719_p12 }
  0x1f   :  { %p1722_p1 = pnand %p1721_p0, %p1715_p11 }
  0x21   :  { %1725 = shalt.err (!%p1722_p1)
}
  0x22   :  { %s1780_s5 = smov 128   ;;  %s1781_s18 = smov 8  }
  0x23   :  { %36 = dma.hbm_to_vmem [thread:$0]  %s1954_s3, 2048, %s31_s13, [#allocation3], %s1780_s5, %s1780_s5, %s1781_s18  }
  0x24   :  { %s1782_s25 = smov [#allocation6]   ;;  %s1726_s29 = scalar_lea.hbm %s1958_s7, 4096 }
  0x25   :  { %s58_s26 = sshll.u32 %s1782_s25, 4  ;;  %p1727_p2 = scmp.ne.s32.totalorder %s1958_s7, %s1726_s29  ;;  %s59_s26 = int_to_ptr.vmem [resolvable:$true] %s58_s26 }
  0x26   :  { %p1730_p3 = scmp.lt.u32.totalorder %s1726_s29, %s1958_s7 }
  0x28   :  { %p1732_p4 = pnand %p1730_p3, %p1727_p2 }
  0x2a   :  { %1735 = shalt.err (!%p1732_p4)
}
  0x2b   :  { %s1736_s16 = scalar_lea.vmem %s59_s26, 4096  ;;  %p1741_p6 = scmp.lt.s32.totalorder %s59_s26, %s59_s26 }
  0x2c   :  { %p1737_p5 = scmp.ne.s32.totalorder %s59_s26, %s1736_s16  ;;  %p1742_p7 = scmp.lt.s32.totalorder %s1736_s16, %s1736_s16 }
  0x2e   :  { %p1743_p8 = por %p1742_p7, %p1741_p6 }
  0x30   :  { %p1744_p9 = pnand %p1743_p8, %p1737_p5 }
  0x32   :  { %1747 = shalt.err (!%p1744_p9)
}
  0x33   :  { %s1783_s3 = smov 64   ;;  %s1784_s13 = smov 4  }
  0x34   :  { %64 = dma.hbm_to_vmem [thread:$0]  %s1958_s7, 4096, %s59_s26, [#allocation5], %s1783_s3, %s1783_s3, %s1784_s13  }
  0x35   :  { %s1785_s20 = smov [#allocation7]   ;;  %s1748_s18 = scalar_lea.hbm %s1960_s9, 1024 }
  0x36   :  { %s72_s21 = sshll.u32 %s1785_s20, 4  ;;  %p1749_p10 = scmp.ne.s32.totalorder %s1960_s9, %s1748_s18  ;;  %s73_s21 = int_to_ptr.vmem [resolvable:$true] %s72_s21 }
  0x37   :  { %p1752_p11 = scmp.lt.u32.totalorder %s1748_s18, %s1960_s9 }
  0x39   :  { %p1754_p12 = pnand %p1752_p11, %p1749_p10 }
  0x3b   :  { %1757 = shalt.err (!%p1754_p12)
}
  0x3c   :  { %s1758_s28 = scalar_lea.vmem %s73_s21, 1024  ;;  %p1763_p0 = scmp.lt.s32.totalorder %s73_s21, %s73_s21 }
  0x3d   :  { %p1759_p13 = scmp.ne.s32.totalorder %s73_s21, %s1758_s28  ;;  %p1764_p1 = scmp.lt.s32.totalorder %s1758_s28, %s1758_s28 }
  0x3f   :  { %p1765_p2 = por %p1764_p1, %p1763_p0 }
  0x41   :  { %p1766_p3 = pnand %p1765_p2, %p1759_p13 }
  0x43   :  { %1769 = shalt.err (!%p1766_p3)
}
  0x44   :  { %78 = dma.hbm_to_vmem [thread:$0]  %s1960_s9, 1024, %s73_s21, [#allocation8], %s1783_s3, %s1783_s3, %s1784_s13  }
  0x45   :  { %1770 = dma.done.wait [#allocation3], 2048  }
  0x46   :  { %1771 = vsyncadd [#allocation3], 4294965248 }
  0x47   :  { %1772 = dma.done.wait [#allocation5], 12288  }
  0x48   :  { %1773 = vsyncadd [#allocation5], 4294955008 }
  0x49   :  { %1774 = dma.done.wait [#allocation8], 1024  }
  0x4a   :  { %1775 = vsyncadd [#allocation8], 4294966272  ;;  %v1786_v0 = vmov 0.0   ;;  %vm1787_vm0 = vmmov 0   ;;  %vm109_vm1 = vcmask 1043456   ;;  %v94_v2 = vld [vmem:[%s1951_s0] sm:$0xff] }
  0x4b   :  { %1483 = vmatprep.subr.bf16.mxu0 %v1786_v0  ;;  %1485 = vmatprep.mubr.msk.bf16.mxu0 %vm1787_vm0, %v1786_v0  ;;  %v97_v1 = vld [vmem:[%s1952_s1] sm:$0xf]  ;;  %v95_v3 = vld [vmem:[%s1951_s0 + $0x8] sm:$0xff]  ;;  %vm105_vm2 = vcmask 64512   ;;  %v1525_v8 = vld [vmem:[#allocation2 + $0x14] ss:$8 sps:$4 sm:$0xff]  }
  0x4c   :  { %v111_v4 = vsel %vm109_vm1, %v97_v1, 0  ;;  %v96_v5 = vpack.c.bf16 %v95_v3, %v94_v2  ;;  %v1522_v6 = vld [vmem:[#allocation2 + $0x4] ss:$8 sps:$4 sm:$0xff]   ;;  %v1524_v7 = vld [vmem:[#allocation2] ss:$8 sps:$4 sm:$0xff]   ;;  %v1788_v22 = vmov 0  }
  0x4d   :  { %1484 = vmatpush3.bf16.msra.mxu0 %v111_v4  ;;  %265 = vmatprep.subr.bf16.mxu1 %v1522_v6  ;;  %v1527_v9 = vld [vmem:[#allocation2 + $0x10] ss:$8 sps:$4 sm:$0xff]   ;;  %v1528_v10 = vld [vmem:[#allocation2 + $0x24] ss:$8 sps:$4 sm:$0xff]   ;;  %v1530_v11 = vld [vmem:[#allocation2 + $0x20] ss:$8 sps:$4 sm:$0xff]  }
  0x4e   :  { %266 = vmatpush1.bf16.msra.mxu1 %v1524_v7  ;;  %v1531_v12 = vld [vmem:[#allocation2 + $0x34] ss:$8 sps:$4 sm:$0xff]   ;;  %v1533_v13 = vld [vmem:[#allocation2 + $0x30] ss:$8 sps:$4 sm:$0xff]   ;;  %v1534_v14 = vld [vmem:[#allocation2 + $0x44] ss:$8 sps:$4 sm:$0xff]   ;;  %297 = vmatprep.mubr.bf16.mxu1 %v1788_v22 }
  0x4f   :  { %267 = vmatprep.subr.bf16.mxu1 %v1525_v8  ;;  %v1536_v15 = vld [vmem:[#allocation2 + $0x40] ss:$8 sps:$4 sm:$0xff]   ;;  %v1537_v16 = vld [vmem:[#allocation2 + $0x54] ss:$8 sps:$4 sm:$0xff]   ;;  %v1539_v17 = vld [vmem:[#allocation2 + $0x50] ss:$8 sps:$4 sm:$0xff]  }
  0x50   :  { %1486 = vmatmul.mubr.msk.bf16.vlgmr.msra.gmra.mrb[0].mxu0 %vm105_vm2, %v96_v5  ;;  %v1540_v18 = vld [vmem:[#allocation2 + $0x64] ss:$8 sps:$4 sm:$0xff]   ;;  %v1542_v19 = vld [vmem:[#allocation2 + $0x60] ss:$8 sps:$4 sm:$0xff]   ;;  %v1543_v20 = vld [vmem:[#allocation2 + $0x74] ss:$8 sps:$4 sm:$0xff]  }
  0x51   :  { %v1545_v21 = vld [vmem:[#allocation2 + $0x70] ss:$8 sps:$4 sm:$0xff]   ;;  %v1548_v24 = vld [vmem:[#allocation4 + $0x4] ss:$16 sps:$4 sm:$0xff]   ;;  %v1551_v25 = vld [vmem:[#allocation4 + $0xc] ss:$16 sps:$4 sm:$0xff]  }
  0x52   :  { %268 = vmatpush1.bf16.msra.mxu1 %v1527_v9  ;;  %v1546_v23 = vld [vmem:[#allocation4] ss:$16 sps:$4 sm:$0xff]   ;;  %v1554_v26 = vld [vmem:[#allocation4 + $0x24] ss:$16 sps:$4 sm:$0xff]   ;;  %720 = vmatprep.subr.bf16.mxu0 %v1548_v24  ;;  %v1549_v61 = vld [vmem:[#allocation4 + $0x8] ss:$16 sps:$4 sm:$0xff]  }
  0x53   :  { %269 = vmatprep.subr.bf16.mxu1 %v1528_v10  ;;  %721 = vmatpush1.bf16.msra.mxu0 %v1546_v23  ;;  %v1552_v27 = vld [vmem:[#allocation4 + $0x20] ss:$16 sps:$4 sm:$0xff]   ;;  %v1560_v28 = vld [vmem:[#allocation4 + $0x44] ss:$16 sps:$4 sm:$0xff]   ;;  %v1557_v63 = vld [vmem:[#allocation4 + $0x2c] ss:$16 sps:$4 sm:$0xff]  }
  0x54   :  { %722 = vmatprep.subr.bf16.mxu0 %v1554_v26  ;;  %v1558_v29 = vld [vmem:[#allocation4 + $0x40] ss:$16 sps:$4 sm:$0xff]   ;;  %v1566_v30 = vld [vmem:[#allocation4 + $0x64] ss:$16 sps:$4 sm:$0xff]   ;;  %v1555_v1 = vld [vmem:[#allocation4 + $0x28] ss:$16 sps:$4 sm:$0xff]  }
  0x55   :  { %v1564_v31 = vld [vmem:[#allocation4 + $0x60] ss:$16 sps:$4 sm:$0xff]   ;;  %v1572_v32 = vld [vmem:[#allocation4 + $0x84] ss:$16 sps:$4 sm:$0xff]   ;;  %v1563_v2 = vld [vmem:[#allocation4 + $0x4c] ss:$16 sps:$4 sm:$0xff]  }
  0x56   :  { %270 = vmatpush1.bf16.msra.mxu1 %v1530_v11  ;;  %v1570_v33 = vld [vmem:[#allocation4 + $0x80] ss:$16 sps:$4 sm:$0xff]   ;;  %v1578_v34 = vld [vmem:[#allocation4 + $0xa4] ss:$16 sps:$4 sm:$0xff]   ;;  %v1561_v3 = vld [vmem:[#allocation4 + $0x48] ss:$16 sps:$4 sm:$0xff]  }
  0x57   :  { %271 = vmatprep.subr.bf16.mxu1 %v1531_v12  ;;  %723 = vmatpush1.bf16.msra.mxu0 %v1552_v27  ;;  %v1576_v35 = vld [vmem:[#allocation4 + $0xa0] ss:$16 sps:$4 sm:$0xff]   ;;  %v1584_v36 = vld [vmem:[#allocation4 + $0xc4] ss:$16 sps:$4 sm:$0xff]   ;;  %v1569_v4 = vld [vmem:[#allocation4 + $0x6c] ss:$16 sps:$4 sm:$0xff]  }
  0x58   :  { %724 = vmatprep.subr.bf16.mxu0 %v1560_v28  ;;  %v1582_v37 = vld [vmem:[#allocation4 + $0xc0] ss:$16 sps:$4 sm:$0xff]   ;;  %v1590_v38 = vld [vmem:[#allocation4 + $0xe4] ss:$16 sps:$4 sm:$0xff]   ;;  %v1567_v5 = vld [vmem:[#allocation4 + $0x68] ss:$16 sps:$4 sm:$0xff]  }
  0x59   :  { %v1588_v39 = vld [vmem:[#allocation4 + $0xe0] ss:$16 sps:$4 sm:$0xff]   ;;  %v1596_v40 = vld [vmem:[#allocation4 + $0x104] ss:$16 sps:$4 sm:$0xff]   ;;  %v1575_v6 = vld [vmem:[#allocation4 + $0x8c] ss:$16 sps:$4 sm:$0xff]  }
  0x5a   :  { %272 = vmatpush1.bf16.msra.mxu1 %v1533_v13  ;;  %v1594_v41 = vld [vmem:[#allocation4 + $0x100] ss:$16 sps:$4 sm:$0xff]   ;;  %v1602_v42 = vld [vmem:[#allocation4 + $0x124] ss:$16 sps:$4 sm:$0xff]   ;;  %v1573_v7 = vld [vmem:[#allocation4 + $0x88] ss:$16 sps:$4 sm:$0xff]  }
  0x5b   :  { %273 = vmatprep.subr.bf16.mxu1 %v1534_v14  ;;  %725 = vmatpush1.bf16.msra.mxu0 %v1558_v29  ;;  %v1600_v43 = vld [vmem:[#allocation4 + $0x120] ss:$16 sps:$4 sm:$0xff]   ;;  %v1608_v44 = vld [vmem:[#allocation4 + $0x144] ss:$16 sps:$4 sm:$0xff]   ;;  %v1581_v8 = vld [vmem:[#allocation4 + $0xac] ss:$16 sps:$4 sm:$0xff]  }
  0x5c   :  { %726 = vmatprep.subr.bf16.mxu0 %v1566_v30  ;;  %v1606_v45 = vld [vmem:[#allocation4 + $0x140] ss:$16 sps:$4 sm:$0xff]   ;;  %v1614_v46 = vld [vmem:[#allocation4 + $0x164] ss:$16 sps:$4 sm:$0xff]   ;;  %v1579_v9 = vld [vmem:[#allocation4 + $0xa8] ss:$16 sps:$4 sm:$0xff]  }
  0x5d   :  { %v1612_v47 = vld [vmem:[#allocation4 + $0x160] ss:$16 sps:$4 sm:$0xff]   ;;  %v1620_v48 = vld [vmem:[#allocation4 + $0x184] ss:$16 sps:$4 sm:$0xff]   ;;  %v1587_v10 = vld [vmem:[#allocation4 + $0xcc] ss:$16 sps:$4 sm:$0xff]  }
  0x5e   :  { %274 = vmatpush1.bf16.msra.mxu1 %v1536_v15  ;;  %v1618_v49 = vld [vmem:[#allocation4 + $0x180] ss:$16 sps:$4 sm:$0xff]   ;;  %v1626_v50 = vld [vmem:[#allocation4 + $0x1a4] ss:$16 sps:$4 sm:$0xff]   ;;  %v1585_v11 = vld [vmem:[#allocation4 + $0xc8] ss:$16 sps:$4 sm:$0xff]  }
  0x5f   :  { %275 = vmatprep.subr.bf16.mxu1 %v1537_v16  ;;  %727 = vmatpush1.bf16.msra.mxu0 %v1564_v31  ;;  %v1624_v51 = vld [vmem:[#allocation4 + $0x1a0] ss:$16 sps:$4 sm:$0xff]   ;;  %v1593_v12 = vld [vmem:[#allocation4 + $0xec] ss:$16 sps:$4 sm:$0xff]   ;;  %v1591_v13 = vld [vmem:[#allocation4 + $0xe8] ss:$16 sps:$4 sm:$0xff]  }
  0x60   :  { %728 = vmatprep.subr.bf16.mxu0 %v1572_v32  ;;  %v1295_v52 = vld [vmem:[%s1953_s2] ss:$0 sm:$0xff]  ;;  %v1599_v14 = vld [vmem:[#allocation4 + $0x10c] ss:$16 sps:$4 sm:$0xff]   ;;  %v1597_v15 = vld [vmem:[#allocation4 + $0x108] ss:$16 sps:$4 sm:$0xff]  }
  0x61   :  { %v1605_v16 = vld [vmem:[#allocation4 + $0x12c] ss:$16 sps:$4 sm:$0xff]   ;;  %v1621_v23 = vld [vmem:[#allocation4 + $0x188] ss:$16 sps:$4 sm:$0xff]   ;;  %v1632_v26 = vld [vmem:[#allocation4 + $0x1c4] ss:$16 sps:$4 sm:$0xff]  }
  0x62   :  { %276 = vmatpush1.bf16.msra.mxu1 %v1539_v17  ;;  %v1603_v17 = vld [vmem:[#allocation4 + $0x128] ss:$16 sps:$4 sm:$0xff]   ;;  %v1623_v22 = vld [vmem:[#allocation4 + $0x18c] ss:$16 sps:$4 sm:$0xff]   ;;  %v1630_v28 = vld [vmem:[#allocation4 + $0x1c0] ss:$16 sps:$4 sm:$0xff]  }
  0x63   :  { %277 = vmatprep.subr.bf16.mxu1 %v1540_v18  ;;  %729 = vmatpush1.bf16.msra.mxu0 %v1570_v33  ;;  %v1611_v18 = vld [vmem:[#allocation4 + $0x14c] ss:$16 sps:$4 sm:$0xff]   ;;  %v1633_v29 = vld [vmem:[#allocation4 + $0x1c8] ss:$16 sps:$4 sm:$0xff]   ;;  %v1638_v30 = vld [vmem:[#allocation4 + $0x1e4] ss:$16 sps:$4 sm:$0xff]  }
  0x64   :  { %730 = vmatprep.subr.bf16.mxu0 %v1578_v34  ;;  %v1629_v24 = vld [vmem:[#allocation4 + $0x1ac] ss:$16 sps:$4 sm:$0xff]   ;;  %v1636_v32 = vld [vmem:[#allocation4 + $0x1e0] ss:$16 sps:$4 sm:$0xff]   ;;  %v1639_v33 = vld [vmem:[#allocation4 + $0x1e8] ss:$16 sps:$4 sm:$0xff]  }
  0x65   :  { %v1635_v27 = vld [vmem:[#allocation4 + $0x1cc] ss:$16 sps:$4 sm:$0xff]   ;;  %v1642_v34 = vld [vmem:[#allocation6 + $0x40] sm:$0xff]  }
  0x66   :  { %278 = vmatpush1.bf16.msra.mxu1 %v1542_v19  ;;  %v1609_v19 = vld [vmem:[#allocation4 + $0x148] ss:$16 sps:$4 sm:$0xff]   ;;  %v1641_v31 = vld [vmem:[#allocation4 + $0x1ec] ss:$16 sps:$4 sm:$0xff]  }
  0x67   :  { %279 = vmatprep.subr.bf16.mxu1 %v1543_v20  ;;  %731 = vmatpush1.bf16.msra.mxu0 %v1576_v35  ;;  %v1617_v20 = vld [vmem:[#allocation4 + $0x16c] ss:$16 sps:$4 sm:$0xff]   ;;  %v1643_v35 = vld [vmem:[#allocation6 + $0xc0] sm:$0xff]  }
  0x68   :  { %732 = vmatprep.subr.bf16.mxu0 %v1584_v36  ;;  %v175_v36 = vlaneseq }
  0x6a   :  { %280 = vmatpush1.bf16.msra.mxu1 %v1545_v21  ;;  %v1615_v21 = vld [vmem:[#allocation4 + $0x168] ss:$16 sps:$4 sm:$0xff]  }
  0x6b   :  { %763 = vmatprep.subr.bf16.mxu1 %v1551_v25  ;;  %733 = vmatpush1.bf16.msra.mxu0 %v1582_v37  ;;  %v1627_v25 = vld [vmem:[#allocation4 + $0x1a8] ss:$16 sps:$4 sm:$0xff]   ;;  %v1912_v37 = vshrl.u32 %v175_v36, 7 }
  0x6c   :  { %734 = vmatprep.subr.bf16.mxu0 %v1590_v38 }
  0x6d   :  { %v177_v38 = vsub.s32 0, %v1912_v37 }
  0x6f   :  { %735 = vmatpush1.bf16.msra.mxu0 %v1588_v39  ;;  %v173_v39 = vld [vmem:[%s1955_s4] sm:$0x3] }
  0x70   :  { %736 = vmatprep.subr.bf16.mxu0 %v1596_v40  ;;  %v181_v40 = vsub.s32 1, %v1912_v37 }
  0x73   :  { %737 = vmatpush1.bf16.msra.mxu0 %v1594_v41  ;;  %v178_v41 = vrot.slane %v173_v39, %v177_v38 }
  0x74   :  { %738 = vmatprep.subr.bf16.mxu0 %v1602_v42  ;;  %v182_v42 = vrot.slane %v173_v39, %v181_v40 }
  0x77   :  { %739 = vmatpush1.bf16.msra.mxu0 %v1600_v43 }
  0x78   :  { %740 = vmatprep.subr.bf16.mxu0 %v1608_v44 }
  0x7b   :  { %741 = vmatpush1.bf16.msra.mxu0 %v1606_v45 }
  0x7c   :  { %742 = vmatprep.subr.bf16.mxu0 %v1614_v46 }
  0x7f   :  { %743 = vmatpush1.bf16.msra.mxu0 %v1612_v47 }
  0x80   :  { %744 = vmatprep.subr.bf16.mxu0 %v1620_v48 }
  0x83   :  { %745 = vmatpush1.bf16.msra.mxu0 %v1618_v49 }
  0x84   :  { %746 = vmatprep.subr.bf16.mxu0 %v1626_v50 }
  0x87   :  { %747 = vmatpush1.bf16.msra.mxu0 %v1624_v51 }
  0x88   :  { %748 = vmatprep.subr.bf16.mxu0 %v1632_v26  ;;  %v394_v26 = vsub.s32 3, %v1912_v37 }
  0x8b   :  { %749 = vmatpush1.bf16.msra.mxu0 %v1630_v28 }
  0x8c   :  { %750 = vmatprep.subr.bf16.mxu0 %v1638_v30 }
  0x8f   :  { %751 = vmatpush1.bf16.msra.mxu0 %v1636_v32 }
  0x90   :  { %1430 = vmatprep.subr.bf16.mxu0 %v1642_v34 }
 0x123   :  { %v147_v53 = vpop.f32.mrb[0].mxu0 }
 0x124   :  { %v148_v54 = vadd.f32 %v1295_v52, %v147_v53  ;;  %v1487_v55 = vpop.f32.mrb[1].mxu0 }
 0x125   :  { %v150_v56 = vpop.f32.mrb[2].mxu0 }
 0x126   :  { %v151_v57 = vadd.f32 %v1295_v52, %v150_v56  ;;  %v1488_v58 = vpop.f32.mrb[3].mxu0  ;;  %v154_v59 = vmax.f32 %v148_v54, 0.0 }
 0x127   :  { %v1645_v58 = vld [vmem:[#allocation6 + $0x80] sm:$0xff]  }
 0x128   :  { %v155_v60 = vmax.f32 %v151_v57, 0.0  ;;  %v1644_v57 = vld [vmem:[#allocation6] sm:$0xff]  }
 0x12a   :  { %v156_v62 = vpack.c.bf16 %v155_v60, %v154_v59  ;;  %v1646_v59 = vld [vmem:[#allocation6 + $0x48] sm:$0xff]  }
 0x12b   :  { %v1647_v60 = vld [vmem:[#allocation6 + $0xc8] sm:$0xff]  }
 0x12c   :  { %298 = vmatmul.mubr.bf16.vlgmr.msra.gmra.mrb[0].mxu1 %v156_v62  ;;  %v1649_v62 = vld [vmem:[#allocation6 + $0x88] sm:$0xff]  }
 0x12d   :  { %764 = vmatpush1.bf16.msra.mxu1 %v1549_v61  ;;  %v1648_v61 = vld [vmem:[#allocation6 + $0x8] sm:$0xff]  }
 0x12e   :  { %765 = vmatprep.subr.bf16.mxu1 %v1557_v63  ;;  %v1650_v63 = vld [vmem:[#allocation6 + $0x50] sm:$0xff]  }
 0x131   :  { %766 = vmatpush1.bf16.msra.mxu1 %v1555_v1  ;;  %v1651_v1 = vld [vmem:[#allocation6 + $0xd0] sm:$0xff]  }
 0x132   :  { %767 = vmatprep.subr.bf16.mxu1 %v1563_v2  ;;  %v1652_v2 = vld [vmem:[#allocation6 + $0x10] sm:$0xff]  }
 0x135   :  { %768 = vmatpush1.bf16.msra.mxu1 %v1561_v3  ;;  %v1653_v3 = vld [vmem:[#allocation6 + $0x90] sm:$0xff]  }
 0x136   :  { %769 = vmatprep.subr.bf16.mxu1 %v1569_v4  ;;  %v1654_v4 = vld [vmem:[#allocation6 + $0x58] sm:$0xff]  }
 0x139   :  { %770 = vmatpush1.bf16.msra.mxu1 %v1567_v5  ;;  %v1655_v5 = vld [vmem:[#allocation6 + $0xd8] sm:$0xff]  }
 0x13a   :  { %771 = vmatprep.subr.bf16.mxu1 %v1575_v6  ;;  %v1656_v6 = vld [vmem:[#allocation6 + $0x18] sm:$0xff]  }
 0x13d   :  { %772 = vmatpush1.bf16.msra.mxu1 %v1573_v7  ;;  %v1657_v7 = vld [vmem:[#allocation6 + $0x98] sm:$0xff]  }
 0x13e   :  { %773 = vmatprep.subr.bf16.mxu1 %v1581_v8  ;;  %v1658_v8 = vld [vmem:[#allocation6 + $0x60] sm:$0xff]  }
 0x141   :  { %774 = vmatpush1.bf16.msra.mxu1 %v1579_v9  ;;  %v1659_v9 = vld [vmem:[#allocation6 + $0xe0] sm:$0xff]  }
 0x142   :  { %775 = vmatprep.subr.bf16.mxu1 %v1587_v10  ;;  %v1660_v10 = vld [vmem:[#allocation6 + $0x20] sm:$0xff]  }
 0x145   :  { %776 = vmatpush1.bf16.msra.mxu1 %v1585_v11  ;;  %v1661_v11 = vld [vmem:[#allocation6 + $0xa0] sm:$0xff]  }
 0x146   :  { %777 = vmatprep.subr.bf16.mxu1 %v1593_v12  ;;  %v1662_v12 = vld [vmem:[#allocation6 + $0x68] sm:$0xff]  }
 0x149   :  { %778 = vmatpush1.bf16.msra.mxu1 %v1591_v13  ;;  %v1663_v13 = vld [vmem:[#allocation6 + $0xe8] sm:$0xff]  }
 0x14a   :  { %779 = vmatprep.subr.bf16.mxu1 %v1599_v14  ;;  %v1664_v14 = vld [vmem:[#allocation6 + $0x28] sm:$0xff]  }
 0x14d   :  { %780 = vmatpush1.bf16.msra.mxu1 %v1597_v15  ;;  %v1665_v15 = vld [vmem:[#allocation6 + $0xa8] sm:$0xff]  }
 0x14e   :  { %781 = vmatprep.subr.bf16.mxu1 %v1605_v16  ;;  %v1666_v16 = vld [vmem:[#allocation6 + $0x70] sm:$0xff]  }
 0x151   :  { %782 = vmatpush1.bf16.msra.mxu1 %v1603_v17  ;;  %v1667_v17 = vld [vmem:[#allocation6 + $0xf0] sm:$0xff]  }
 0x152   :  { %783 = vmatprep.subr.bf16.mxu1 %v1611_v18  ;;  %v1668_v18 = vld [vmem:[#allocation6 + $0x30] sm:$0xff]  }
 0x155   :  { %784 = vmatpush1.bf16.msra.mxu1 %v1609_v19  ;;  %v1669_v19 = vld [vmem:[#allocation6 + $0xb0] sm:$0xff]  }
 0x156   :  { %785 = vmatprep.subr.bf16.mxu1 %v1617_v20  ;;  %v1670_v20 = vld [vmem:[#allocation6 + $0x78] sm:$0xff]  }
 0x159   :  { %786 = vmatpush1.bf16.msra.mxu1 %v1615_v21  ;;  %v1671_v21 = vld [vmem:[#allocation6 + $0xf8] sm:$0xff]  }
 0x15a   :  { %787 = vmatprep.subr.bf16.mxu1 %v1623_v22  ;;  %v1672_v22 = vld [vmem:[#allocation6 + $0x38] sm:$0xff]  }
 0x15d   :  { %788 = vmatpush1.bf16.msra.mxu1 %v1621_v23  ;;  %v1673_v23 = vld [vmem:[#allocation6 + $0xb8] sm:$0xff]  }
 0x15e   :  { %789 = vmatprep.subr.bf16.mxu1 %v1629_v24  ;;  %v390_v24 = vsub.s32 2, %v1912_v37 }
 0x161   :  { %790 = vmatpush1.bf16.msra.mxu1 %v1627_v25  ;;  %v378_v25 = vld [vmem:[%s1957_s6] sm:$0xf] }
 0x162   :  { %791 = vmatprep.subr.bf16.mxu1 %v1635_v27  ;;  %v383_v27 = vrot.slane %v378_v25, %v177_v38  ;;  %v391_v28 = vrot.slane %v378_v25, %v390_v24  ;;  %v395_v30 = vrot.slane %v378_v25, %v394_v26 }
 0x165   :  { %792 = vmatpush1.bf16.msra.mxu1 %v1633_v29  ;;  %v387_v29 = vrot.slane %v378_v25, %v181_v40 }
 0x166   :  { %793 = vmatprep.subr.bf16.mxu1 %v1641_v31 }
 0x169   :  { %794 = vmatpush1.bf16.msra.mxu1 %v1639_v33 }
 0x16a   :  { %1452 = vmatprep.subr.bf16.mxu1 %v1643_v35 }
 0x1ff   :  { %v299_v43 = vpop.f32.mrb[0].mxu1 }
 0x200   :  { %v300_v44 = vadd.f32 %v299_v43, %v178_v41  ;;  %v301_v45 = vpop.f32.mrb[1].mxu1 }
 0x201   :  { %v302_v46 = vadd.f32 %v301_v45, %v182_v42  ;;  %v303_v47 = vpop.f32.mrb[2].mxu1 }
 0x202   :  { %v304_v48 = vadd.f32 %v303_v47, %v178_v41  ;;  %v305_v49 = vpop.f32.mrb[3].mxu1  ;;  %v308_v51 = vmax.f32 %v300_v44, 0.0 }
 0x203   :  { %v306_v50 = vadd.f32 %v305_v49, %v182_v42  ;;  %v309_v53 = vmax.f32 %v302_v46, 0.0 }
 0x204   :  { %v310_v52 = vmax.f32 %v304_v48, 0.0 }
 0x205   :  { %v311_v54 = vmax.f32 %v306_v50, 0.0 }
 0x206   :  { %v312_v55 = vpack.c.bf16 %v310_v52, %v308_v51 }
 0x207   :  { %v313_v56 = vpack.c.bf16 %v311_v54, %v309_v53 }
 0x209   :  { %752 = vmatprep.mubr.bf16.mxu0 %v313_v56  ;;  %795 = vmatprep.mubr.bf16.mxu1 %v313_v56 }
 0x20a   :  { %753 = vmatmul.mubr.bf16.vlgmr.msra.gmra.mrb[4].mxu0 %v312_v55  ;;  %796 = vmatmul.mubr.bf16.vlgmr.msra.gmra.mrb[4].mxu1 %v312_v55 }
 0x20b   :  { %1431 = vmatpush3.bf16.msra.mxu0 %v1644_v57  ;;  %1453 = vmatpush3.bf16.msra.mxu1 %v1645_v58 }
 0x20c   :  { %1432 = vmatprep.subr.bf16.mxu0 %v1646_v59  ;;  %1454 = vmatprep.subr.bf16.mxu1 %v1647_v60  ;;  %v1674_v59 = vld [vmem:[#allocation7] sm:$0xff]   ;;  %v1675_v60 = vld [vmem:[#allocation7 + $0x8] sm:$0xff]  }
 0x20f   :  { %1433 = vmatpush3.bf16.msra.mxu0 %v1648_v61  ;;  %1455 = vmatpush3.bf16.msra.mxu1 %v1649_v62  ;;  %v1676_v61 = vld [vmem:[#allocation7 + $0x10] sm:$0xff]   ;;  %v1677_v62 = vld [vmem:[#allocation7 + $0x18] sm:$0xff]  }
 0x210   :  { %1434 = vmatprep.subr.bf16.mxu0 %v1650_v63  ;;  %1456 = vmatprep.subr.bf16.mxu1 %v1651_v1  ;;  %v1678_v63 = vld [vmem:[#allocation7 + $0x20] sm:$0xff]   ;;  %v1679_v1 = vld [vmem:[#allocation7 + $0x28] sm:$0xff]  }
 0x213   :  { %1435 = vmatpush3.bf16.msra.mxu0 %v1652_v2  ;;  %1457 = vmatpush3.bf16.msra.mxu1 %v1653_v3  ;;  %v1680_v2 = vld [vmem:[#allocation7 + $0x30] sm:$0xff]   ;;  %v1681_v3 = vld [vmem:[#allocation7 + $0x38] sm:$0xff]  }
 0x214   :  { %1436 = vmatprep.subr.bf16.mxu0 %v1654_v4  ;;  %1458 = vmatprep.subr.bf16.mxu1 %v1655_v5 }
 0x217   :  { %1437 = vmatpush3.bf16.msra.mxu0 %v1656_v6  ;;  %1459 = vmatpush3.bf16.msra.mxu1 %v1657_v7  ;;  %v1377_v6 = vld [vmem:[%s1959_s8] ss:$0 sm:$0xff] }
 0x218   :  { %1438 = vmatprep.subr.bf16.mxu0 %v1658_v8  ;;  %1460 = vmatprep.subr.bf16.mxu1 %v1659_v9 }
 0x21b   :  { %1439 = vmatpush3.bf16.msra.mxu0 %v1660_v10  ;;  %1461 = vmatpush3.bf16.msra.mxu1 %v1661_v11 }
 0x21c   :  { %1440 = vmatprep.subr.bf16.mxu0 %v1662_v12  ;;  %1462 = vmatprep.subr.bf16.mxu1 %v1663_v13 }
 0x21f   :  { %1441 = vmatpush3.bf16.msra.mxu0 %v1664_v14  ;;  %1463 = vmatpush3.bf16.msra.mxu1 %v1665_v15 }
 0x220   :  { %1442 = vmatprep.subr.bf16.mxu0 %v1666_v16  ;;  %1464 = vmatprep.subr.bf16.mxu1 %v1667_v17 }
 0x223   :  { %1443 = vmatpush3.bf16.msra.mxu0 %v1668_v18  ;;  %1465 = vmatpush3.bf16.msra.mxu1 %v1669_v19 }
 0x224   :  { %1444 = vmatprep.subr.bf16.mxu0 %v1670_v20  ;;  %1466 = vmatprep.subr.bf16.mxu1 %v1671_v21 }
 0x227   :  { %1445 = vmatpush3.bf16.msra.mxu0 %v1672_v22  ;;  %1467 = vmatpush3.bf16.msra.mxu1 %v1673_v23  ;;  %v1410_v23 = vld [vmem:[%s1961_s10] ss:$0 sm:$0xff] }
 0x228   :  { %1489 = vmatprep.subr.bf16.mxu0 %v1786_v0 }
 0x2dd   :  { %v754_v31 = vpop.f32.mrb[4].mxu0  ;;  %v797_v32 = vpop.f32.mrb[4].mxu1 }
 0x2de   :  { %v755_v33 = vadd.f32 %v754_v31, %v383_v27  ;;  %v798_v34 = vadd.f32 %v797_v32, %v391_v28  ;;  %v756_v35 = vpop.f32.mrb[5].mxu0  ;;  %v799_v36 = vpop.f32.mrb[5].mxu1 }
 0x2df   :  { %v757_v39 = vadd.f32 %v756_v35, %v387_v29  ;;  %v800_v41 = vadd.f32 %v799_v36, %v395_v30  ;;  %v758_v42 = vpop.f32.mrb[6].mxu0  ;;  %v801_v43 = vpop.f32.mrb[6].mxu1 }
 0x2e0   :  { %v759_v44 = vadd.f32 %v758_v42, %v383_v27  ;;  %v802_v45 = vadd.f32 %v801_v43, %v391_v28  ;;  %v760_v46 = vpop.f32.mrb[7].mxu0  ;;  %v803_v47 = vpop.f32.mrb[7].mxu1  ;;  %v806_v49 = vmax.f32 %v755_v33, 0.0  ;;  %v808_v37 = vmax.f32 %v798_v34, 0.0 }
 0x2e1   :  { %v761_v38 = vadd.f32 %v760_v46, %v387_v29  ;;  %v804_v48 = vadd.f32 %v803_v47, %v395_v30  ;;  %v807_v51 = vmax.f32 %v757_v39, 0.0  ;;  %v809_v52 = vmax.f32 %v800_v41, 0.0 }
 0x2e2   :  { %v810_v40 = vmax.f32 %v759_v44, 0.0  ;;  %v812_v50 = vmax.f32 %v802_v45, 0.0 }
 0x2e3   :  { %v811_v53 = vmax.f32 %v761_v38, 0.0  ;;  %v813_v54 = vmax.f32 %v804_v48, 0.0 }
 0x2e4   :  { %v814_v55 = vpack.c.bf16 %v810_v40, %v806_v49  ;;  %v816_v56 = vpack.c.bf16 %v812_v50, %v808_v37 }
 0x2e5   :  { %v815_v57 = vpack.c.bf16 %v811_v53, %v807_v51  ;;  %v817_v58 = vpack.c.bf16 %v813_v54, %v809_v52 }
 0x2e7   :  { %1113 = vmatprep.mubr.bf16.mxu0 %v815_v57  ;;  %1154 = vmatprep.mubr.bf16.mxu1 %v817_v58 }
 0x2e8   :  { %1114 = vmatmul.mubr.bf16.vlgmr.msra.gmra.mrb[8].mxu0 %v814_v55  ;;  %1155 = vmatmul.mubr.bf16.vlgmr.msra.gmra.mrb[8].mxu1 %v816_v56 }
 0x2e9   :  { %1490 = vmatpush3.bf16.msra.mxu0 %v1674_v59  ;;  %1505 = vmatprep.mubr.msk.bf16.mxu0 %vm1787_vm0, %v1786_v0 }
 0x2ea   :  { %1491 = vmatprep.subr.bf16.mxu0 %v1786_v0 }
 0x2ed   :  { %1492 = vmatpush3.bf16.msra.mxu0 %v1675_v60 }
 0x2ee   :  { %1493 = vmatprep.subr.bf16.mxu0 %v1786_v0 }
 0x2f1   :  { %1494 = vmatpush3.bf16.msra.mxu0 %v1676_v61 }
 0x2f2   :  { %1495 = vmatprep.subr.bf16.mxu0 %v1786_v0 }
 0x2f5   :  { %1496 = vmatpush3.bf16.msra.mxu0 %v1677_v62 }
 0x2f6   :  { %1497 = vmatprep.subr.bf16.mxu0 %v1786_v0 }
 0x2f9   :  { %1498 = vmatpush3.bf16.msra.mxu0 %v1678_v63 }
 0x2fa   :  { %1499 = vmatprep.subr.bf16.mxu0 %v1786_v0 }
 0x2fd   :  { %1500 = vmatpush3.bf16.msra.mxu0 %v1679_v1 }
 0x2fe   :  { %1501 = vmatprep.subr.bf16.mxu0 %v1786_v0 }
 0x301   :  { %1502 = vmatpush3.bf16.msra.mxu0 %v1680_v2 }
 0x302   :  { %1503 = vmatprep.subr.bf16.mxu0 %v1786_v0 }
 0x305   :  { %1504 = vmatpush3.bf16.msra.mxu0 %v1681_v3 }
 0x3bb   :  { %v1446_v4 = vpop.f32.mrb[8].mxu0  ;;  %v1468_v5 = vpop.f32.mrb[8].mxu1 }
 0x3bc   :  { %v1447_v7 = vpop.f32.mrb[9].mxu0  ;;  %v1469_v8 = vpop.f32.mrb[9].mxu1 }
 0x3bd   :  { %v1448_v9 = vadd.f32 %v1447_v7, %v1446_v4  ;;  %v1470_v10 = vadd.f32 %v1469_v8, %v1468_v5  ;;  %v1449_v11 = vpop.f32.mrb[10].mxu0  ;;  %v1471_v12 = vpop.f32.mrb[10].mxu1 }
 0x3be   :  { %v1450_v13 = vpop.f32.mrb[11].mxu0  ;;  %v1472_v14 = vpop.f32.mrb[11].mxu1 }
 0x3bf   :  { %v1116_v15 = vadd.f32 %v1448_v9, %v1377_v6  ;;  %v1451_v16 = vadd.f32 %v1450_v13, %v1449_v11  ;;  %v1473_v17 = vadd.f32 %v1472_v14, %v1471_v12 }
 0x3c1   :  { %v1157_v0 = vadd.f32 %v1470_v10, %v1116_v15  ;;  %v1119_v18 = vadd.f32 %v1451_v16, %v1377_v6 }
 0x3c3   :  { %v1160_v19 = vadd.f32 %v1473_v17, %v1119_v18  ;;  %v1163_v20 = vmax.f32 %v1157_v0, 0.0 }
 0x3c5   :  { %v1164_v21 = vmax.f32 %v1160_v19, 0.0 }
 0x3c7   :  { %v1165_v22 = vpack.c.bf16 %v1164_v21, %v1163_v20 }
 0x3c9   :  { %1506 = vmatmul.mubr.bf16.vlgmr.msra.gmra.mrb[12].mxu0 %v1165_v22 }
 0x49c   :  { %v1271_v24 = vpop.f32.mrb[12].mxu0 }
 0x49d   :  { %v1507_v25 = vpop.f32.mrb[13].mxu0  ;;  %v1272_v27 = vadd.f32 %v1410_v23, %v1271_v24 }
 0x49e   :  { %v1274_v26 = vpop.f32.mrb[14].mxu0 }
 0x49f   :  { %v1275_v28 = vadd.f32 %v1410_v23, %v1274_v26  ;;  %v1508_v29 = vpop.f32.mrb[15].mxu0 }
 0x4a1   :  { %v1426_v30 = vpack.c.bf16 %v1275_v28, %v1272_v27 }
 0x4a3   :  { %1427 = vst [vmem:[%s1962_s11] sm:$0xff] %v1426_v30  }
 0x4a4   :  { %1292 = vsyncpa [#allocation3], 1 }
 0x4a5   :  { %1293 = vsyncpa [#allocation5], 1 }
 0x4a6   :  { %1294 = vsyncpa [#allocation8], 1 }

</bundles_post_ra>
